<compile_context>
chip_gen: v7x
topology: tpu7x:2x2x1
jax: 0.10.0
libtpu: 0.0.40
codegen_flags: <defaults>
</compile_context>

<pallas_src>
import jax
import jax.numpy as jnp
from jax.experimental import pallas as pl
from jax.experimental.pallas import tpu as pltpu

_LANES = 128        # vreg lane width
_TILE_ROWS = 4096   # 4096 x 128 x 4B = 2 MiB per f32 tile (1 MiB for bf16)


def _linear1x1_kernel(x_ref, w_ref, b_ref, o_ref):
    # x_ref: (tile_rows, 128) in VMEM (f32 or bf16); w_ref/b_ref: (1, 1) f32 in SMEM.
    w = w_ref[0, 0]
    b = b_ref[0, 0]
    xv = x_ref[...].astype(jnp.float32)        # in-register upcast (free: VALU slack)
    o_ref[...] = (xv * w + b).astype(o_ref.dtype)


def dummy_model_forward(x, weight, bias):
    """x: (..., 1), weight: (1, 1), bias: (1,) -> same shape/dtype as x."""
    orig_shape = x.shape
    orig_dtype = x.dtype

    # Keep HBM/VMEM I/O in the input dtype for f32 / bf16 (halves bytes for bf16);
    # other dtypes fall back to f32 compute + final cast.
    if orig_dtype in (jnp.dtype(jnp.float32), jnp.dtype(jnp.bfloat16)):
        io_dtype = orig_dtype
    else:
        io_dtype = jnp.dtype(jnp.float32)

    w = jnp.asarray(weight, jnp.float32).reshape(1, 1)
    b = jnp.asarray(bias, jnp.float32).reshape(1, 1)

    # ---- lane-dense repack: (..., 1) -> (rows, 128), padding n only to 128 ----
    flat = x.reshape(-1)
    if flat.dtype != io_dtype:
        flat = flat.astype(io_dtype)
    n = flat.shape[0]
    rows = max(1, pl.cdiv(n, _LANES))

    pad = rows * _LANES - n                     # <= 127 elements, 0 if aligned
    if pad:
        flat = jnp.pad(flat, (0, pad))          # padded elems compute 0*w+b, sliced off
    x2d = flat.reshape(rows, _LANES)

    # Single full-array block for small inputs (always a legal block shape);
    # 2 MiB tiles with a ragged trailing block otherwise.
    tile_rows = min(rows, _TILE_ROWS)
    grid = (pl.cdiv(rows, tile_rows),)

    out2d = pl.pallas_call(
        _linear1x1_kernel,
        out_shape=jax.ShapeDtypeStruct((rows, _LANES), io_dtype),
        grid=grid,
        in_specs=[
            pl.BlockSpec((tile_rows, _LANES), lambda i: (i, 0)),          # x tile (VMEM)
            pl.BlockSpec(memory_space=pltpu.MemorySpace.SMEM),            # weight scalar
            pl.BlockSpec(memory_space=pltpu.MemorySpace.SMEM),            # bias scalar
        ],
        out_specs=pl.BlockSpec((tile_rows, _LANES), lambda i: (i, 0)),
        input_output_aliases={0: 0},            # reuse the repacked input buffer
        compiler_params=pltpu.CompilerParams(
            # On v7x, pltpu.CORE_PARALLEL here can engage both TensorCores.
            dimension_semantics=("parallel",),
        ),
    )(x2d, w, b)

    # ---- aligned fast path: no slice copy, no cast ----
    if pad == 0 and io_dtype == orig_dtype:
        return out2d.reshape(orig_shape)

    y = out2d.reshape(-1)[:n].reshape(orig_shape)
    if y.dtype != orig_dtype:
        y = y.astype(orig_dtype)
    return y


if __name__ == "__main__":
    key = jax.random.PRNGKey(0)
    kx, kw, kb, kx2, kx3 = jax.random.split(key, 5)

    # Deterministic parameter init (mimics PyTorch's U(-1, 1) bound for in_features=1).
    weight = jax.random.uniform(kw, (1, 1), minval=-1.0, maxval=1.0, dtype=jnp.float32)
    bias = jax.random.uniform(kb, (1,), minval=-1.0, maxval=1.0, dtype=jnp.float32)

    # jit the wrapper so the repacked x2d is an intermediate and the
    # input_output_aliases buffer reuse is handled cleanly by XLA.
    fwd = jax.jit(dummy_model_forward)

    # 1) Small shape implied by nn.Linear(1, 1): batch of 8 samples, 1 feature.
    N = 8
    x = jax.random.normal(kx, (N, 1), dtype=jnp.float32)
    y = jax.block_until_ready(fwd(x, weight, bias))
    y_ref = x @ weight.T + bias
    assert y.shape == (N, 1) and y.dtype == x.dtype
    assert jnp.allclose(y, y_ref, atol=1e-6, rtol=1e-6)

    # 2) Multi-block path with a ragged trailing tile + aligned fast path (no pad/slice).
    N2 = (_TILE_ROWS + 100) * _LANES            # rows = 4196 -> 2 grid steps
    x2 = jax.random.normal(kx2, (N2, 1), dtype=jnp.float32)
    y2 = jax.block_until_ready(fwd(x2, weight, bias))
    y2_ref = x2 * weight[0, 0] + bias[0]
    assert y2.shape == (N2, 1)
    assert jnp.allclose(y2, y2_ref, atol=1e-6, rtol=1e-6)

    # 3) bf16 I/O path (half the HBM traffic; f32 compute in-register).
    N3 = 32 * _LANES
    x3 = jax.random.normal(kx3, (N3, 1), dtype=jnp.float32).astype(jnp.bfloat16)
    y3 = jax.block_until_ready(fwd(x3, weight, bias))
    y3_ref = (x3.astype(jnp.float32) * weight[0, 0] + bias[0]).astype(jnp.bfloat16)
    assert y3.shape == (N3, 1) and y3.dtype == jnp.bfloat16
    assert jnp.allclose(y3.astype(jnp.float32), y3_ref.astype(jnp.float32),
                        atol=2e-2, rtol=2e-2)

    print("KERNEL_OK")
</pallas_src>

<mosaic_0001>
module attributes {stable_mosaic.version = 11 : i64} {
  func.func @_linear1x1_kernel(%arg0: i32, %arg1: memref<1x128xf32, #tpu.memory_space<vmem>>, %arg2: memref<1x1xf32, #tpu.memory_space<smem>>, %arg3: memref<1x1xf32, #tpu.memory_space<smem>>, %arg4: memref<1x128xf32, #tpu.memory_space<vmem>>) attributes {dimension_semantics = [#tpu.dimension_semantics<parallel>], iteration_bounds = array<i64: 1>, scalar_prefetch = 0 : i64, scratch_operands = 0 : i64, tpu.core_type = #tpu.core_type<tc>, window_params = [{transform_indices = @transform_0, window_bounds = array<i64: 1, 128>}, {transform_indices = @transform_1, window_bounds = array<i64: 1, 1>}, {transform_indices = @transform_2, window_bounds = array<i64: 1, 1>}, {transform_indices = @transform_3, window_bounds = array<i64: 1, 128>}]} {
    %c0 = arith.constant 0 : index
    %c0_0 = arith.constant 0 : index
    %0 = memref.load %arg2[%c0, %c0_0] : memref<1x1xf32, #tpu.memory_space<smem>>
    %c0_1 = arith.constant 0 : index
    %c0_2 = arith.constant 0 : index
    %1 = memref.load %arg3[%c0_1, %c0_2] : memref<1x1xf32, #tpu.memory_space<smem>>
    %c0_3 = arith.constant 0 : index
    %c0_4 = arith.constant 0 : index
    %2 = vector.load %arg1[%c0_3, %c0_4] : memref<1x128xf32, #tpu.memory_space<vmem>>, vector<1x128xf32>
    %3 = vector.broadcast %0 : f32 to vector<1x128xf32>
    %4 = arith.mulf %2, %3 : vector<1x128xf32>
    %5 = vector.broadcast %1 : f32 to vector<1x128xf32>
    %6 = arith.addf %4, %5 : vector<1x128xf32>
    %c0_5 = arith.constant 0 : index
    %c0_6 = arith.constant 0 : index
    %7 = vector.load %arg4[%c0_5, %c0_6] : memref<1x128xf32, #tpu.memory_space<vmem>>, vector<1x128xf32>
    tpu.vector_store %arg4[%c0_5, %c0_6], %6 {strides = array<i32>} : memref<1x128xf32, #tpu.memory_space<vmem>>, vector<1x128xf32>,
    return
  }
  func.func @transform_0(%arg0: i32) -> (i32, i32) {
    %c0_i32 = arith.constant 0 : i32
    %c0_i32_0 = arith.constant 0 : i32
    return %arg0, %c0_i32 : i32, i32
  }
  func.func @transform_1(%arg0: i32) -> (i32, i32) {
    %c0_i32 = arith.constant 0 : i32
    %c0_i32_0 = arith.constant 0 : i32
    %c0_i32_1 = arith.constant 0 : i32
    return %c0_i32, %c0_i32_0 : i32, i32
  }
  func.func @transform_2(%arg0: i32) -> (i32, i32) {
    %c0_i32 = arith.constant 0 : i32
    %c0_i32_0 = arith.constant 0 : i32
    %c0_i32_1 = arith.constant 0 : i32
    return %c0_i32, %c0_i32_0 : i32, i32
  }
  func.func @transform_3(%arg0: i32) -> (i32, i32) {
    %c0_i32 = arith.constant 0 : i32
    %c0_i32_0 = arith.constant 0 : i32
    return %arg0, %c0_i32 : i32, i32
  }
}

</mosaic_0001>

<bundles_post_ra>
// kernel: dummy_model_forward.1
= control target key start
LH: loop header
LB: loop body
LE: loop exit
PB: predicated region body
PF: predicated region fallthrough
CT: control target
= control target key end

     0   :  { %s60_s0 = inlined_call_operand.vmem [shape: f32[1,128], index: 0, kind: input, shape index: {}, may-alias: {0,3}]   ;;  %s61_s1 = inlined_call_operand.<no memory space> [shape: f32[1,1], index: 1, kind: input, shape index: {}]   ;;  %s62_s2 = inlined_call_operand.<no memory space> [shape: f32[1,1], index: 2, kind: input, shape index: {}]   ;;  %s63_s3 = inlined_call_operand.vmem [shape: f32[1,128], index: 3, kind: output, shape index: {}, may-alias: {0,3}]  }
   0x1   :  { %v18_v0 = vld [vmem:[%s60_s0] sm:$0x1]  ;;  %v19_v1 = vstv %s61_s1  ;;  %v21_v2 = vstv %s62_s2 }
   0x2   :  { %v20_v3 = vmul.f32 %v19_v1, %v18_v0 }
   0x4   :  { %v22_v4 = vadd.f32 %v21_v2, %v20_v3 }
   0x6   :  { %23 = vst [vmem:[%s63_s3] sm:$0x1] %v22_v4 }

</bundles_post_ra>
